<compile_context>
chip_gen: v6e
topology: v6e:2x2x1
jax: 0.10.0
libtpu: 0.0.40
codegen_flags: <defaults>
</compile_context>

<pallas_src>
import math

import jax
import jax.numpy as jnp
import numpy as np
from jax.experimental import pallas as pl
from jax.experimental.pallas import tpu as pltpu


# ---------------------------------------------------------------------------
# Parameter setup (mirrors PositionalEncoding.__init__)
# ---------------------------------------------------------------------------
def make_pe_table(max_len: int, d_model: int, dtype=jnp.float32) -> jnp.ndarray:
    """Returns pe of shape (max_len, 1, d_model), matching the torch buffer."""
    position = jnp.arange(0, max_len, dtype=jnp.float32)[:, None]          # (L, 1)
    div_term = jnp.exp(
        jnp.arange(0, d_model, 2, dtype=jnp.float32) * (-math.log(10000.0) / d_model)
    )                                                                       # (D/2,)
    pe = jnp.zeros((max_len, d_model), dtype=jnp.float32)
    pe = pe.at[:, 0::2].set(jnp.sin(position * div_term))
    pe = pe.at[:, 1::2].set(jnp.cos(position * div_term))
    return pe[:, None, :].astype(dtype)                                     # (L, 1, D)


# ---------------------------------------------------------------------------
# Pallas kernel: y = (x + pe_broadcast) [* keep_mask_scaled]
# ---------------------------------------------------------------------------
def _make_kernel(batch: int, has_mask: bool):
    def kernel(x_ref, pe_ref, *rest):
        if has_mask:
            m_ref, o_ref = rest
        else:
            (o_ref,) = rest
        pe = pe_ref[...]                       # (tile_s, D)
        if batch > 1:
            pe = jnp.tile(pe, (1, batch))      # (tile_s, B*D), lane-tiled broadcast
        y = x_ref[...] + pe
        if has_mask:
            y = y * m_ref[...]                 # mask is pre-scaled by 1/(1-p)
        o_ref[...] = y.astype(o_ref.dtype)
    return kernel


def _pick_tile_s(S: int, row_bytes: int, target_block_bytes: int) -> int:
    """Pick a sublane-aligned sequence tile targeting ~target_block_bytes per x block."""
    if S <= 8:
        return S                               # full dim -> always a legal block
    rows = (target_block_bytes // max(row_bytes, 1)) // 8 * 8
    return int(min(S, max(8, rows)))           # either full S or a multiple of 8


def positional_encoding_forward(
    x: jnp.ndarray,
    pe: jnp.ndarray,
    *,
    dropout_p: float = 0.0,
    training: bool = False,
    rng_key=None,
    target_block_bytes: int = 1 << 20,         # ~1 MiB x-block: safe on v5e/v6e/v7x
) -> jnp.ndarray:
    """x: (S, B, D); pe: (max_len, 1, D).  Returns dropout(x + pe[:S])."""
    S, B, D = x.shape
    apply_dropout = training and dropout_p > 0.0
    if apply_dropout and dropout_p >= 1.0:     # avoid 1/(1-p) blow-up / uint overflow
        return jnp.zeros_like(x)

    x2 = x.reshape(S, B * D)                   # free (contiguous) reshape
    pe2 = pe[:S, 0, :].astype(x.dtype)         # (S, D)

    itemsize = jnp.dtype(x.dtype).itemsize
    tile_s = _pick_tile_s(S, B * D * itemsize, target_block_bytes)
    grid = (pl.cdiv(S, tile_s),)               # handles remainders via masking

    in_specs = [
        pl.BlockSpec((tile_s, B * D), lambda i: (i, 0)),   # x: sublane=tile_s, lane=B*D
        pl.BlockSpec((tile_s, D), lambda i: (i, 0)),       # pe: 1/B of x traffic
    ]
    operands = [x2, pe2]

    if apply_dropout:
        if rng_key is None:
            rng_key = jax.random.PRNGKey(0)
        keep = jax.random.bernoulli(rng_key, 1.0 - dropout_p, (S, B * D))
        mask = keep.astype(x.dtype) * jnp.asarray(1.0 / (1.0 - dropout_p), x.dtype)
        in_specs.append(pl.BlockSpec((tile_s, B * D), lambda i: (i, 0)))
        operands.append(mask)

    out2 = pl.pallas_call(
        _make_kernel(B, apply_dropout),
        out_shape=jax.ShapeDtypeStruct((S, B * D), x.dtype),
        grid=grid,
        in_specs=in_specs,
        out_specs=pl.BlockSpec((tile_s, B * D), lambda i: (i, 0)),
        compiler_params=pltpu.CompilerParams(
            dimension_semantics=("parallel",),        # no carried state across steps
            vmem_limit_bytes=32 * 1024 * 1024,        # raises v5e's 16 MiB default
        ),
    )(*operands)
    return out2.reshape(S, B, D)


# ---------------------------------------------------------------------------
# Demo / correctness check
# ---------------------------------------------------------------------------
if __name__ == "__main__":
    # Small shapes: seq=8, batch=2, d_model=128 (lane-friendly), max_len=64, p=0.1
    S, B, D, MAX_LEN = 8, 2, 128, 64
    DROPOUT_P = 0.1

    key = jax.random.PRNGKey(0)
    kx, kd = jax.random.split(key)
    x = jax.random.normal(kx, (S, B, D), dtype=jnp.float32)
    pe = make_pe_table(MAX_LEN, D, dtype=jnp.float32)

    # Eval mode (dropout is identity) -- deterministic, verify against reference.
    y_eval = positional_encoding_forward(x, pe, dropout_p=DROPOUT_P, training=False)
    y_eval = jax.block_until_ready(y_eval)
    y_ref = x + pe[:S]                         # broadcast (S,1,D) over batch
    np.testing.assert_allclose(np.asarray(y_eval), np.asarray(y_ref), rtol=1e-6, atol=1e-6)

    # Training mode: every element must be 0 (dropped) or (x+pe)/(1-p) (kept & scaled).
    y_train = positional_encoding_forward(
        x, pe, dropout_p=DROPOUT_P, training=True, rng_key=kd
    )
    y_train = jax.block_until_ready(y_train)
    assert y_train.shape == (S, B, D)
    yt = np.asarray(y_train)
    scaled_ref = np.asarray(y_ref) / (1.0 - DROPOUT_P)
    ok = np.isclose(yt, 0.0, atol=1e-6) | np.isclose(yt, scaled_ref, rtol=1e-5, atol=1e-5)
    assert ok.all(), "dropout output not consistent with keep/drop semantics"

    print("KERNEL_OK")
</pallas_src>

<mosaic_0001>
module attributes {stable_mosaic.version = 11 : i64} {
  func.func @kernel(%arg0: i32, %arg1: memref<8x256xf32, #tpu.memory_space<vmem>>, %arg2: memref<8x128xf32, #tpu.memory_space<vmem>>, %arg3: memref<8x256xf32, #tpu.memory_space<vmem>>) attributes {dimension_semantics = [#tpu.dimension_semantics<parallel>], iteration_bounds = array<i64: 1>, scalar_prefetch = 0 : i64, scratch_operands = 0 : i64, tpu.core_type = #tpu.core_type<tc>, window_params = [{transform_indices = @transform_0, window_bounds = array<i64: 8, 256>}, {transform_indices = @transform_1, window_bounds = array<i64: 8, 128>}, {transform_indices = @transform_2, window_bounds = array<i64: 8, 256>}]} {
    %c0 = arith.constant 0 : index
    %c0_0 = arith.constant 0 : index
    %0 = vector.load %arg2[%c0, %c0_0] : memref<8x128xf32, #tpu.memory_space<vmem>>, vector<8x128xf32>
    %1 = tpu.concatenate %0, %0 in 1 : vector<8x128xf32>, vector<8x128xf32> -> vector<8x256xf32>
    %c0_1 = arith.constant 0 : index
    %c0_2 = arith.constant 0 : index
    %2 = vector.load %arg1[%c0_1, %c0_2] : memref<8x256xf32, #tpu.memory_space<vmem>>, vector<8x256xf32>
    %3 = arith.addf %2, %1 : vector<8x256xf32>
    %c0_3 = arith.constant 0 : index
    %c0_4 = arith.constant 0 : index
    %4 = vector.load %arg3[%c0_3, %c0_4] : memref<8x256xf32, #tpu.memory_space<vmem>>, vector<8x256xf32>
    tpu.vector_store %arg3[%c0_3, %c0_4], %3 {strides = array<i32>} : memref<8x256xf32, #tpu.memory_space<vmem>>, vector<8x256xf32>,
    return
  }
  func.func @transform_0(%arg0: i32) -> (i32, i32) {
    %c0_i32 = arith.constant 0 : i32
    %c0_i32_0 = arith.constant 0 : i32
    return %arg0, %c0_i32 : i32, i32
  }
  func.func @transform_1(%arg0: i32) -> (i32, i32) {
    %c0_i32 = arith.constant 0 : i32
    %c0_i32_0 = arith.constant 0 : i32
    return %arg0, %c0_i32 : i32, i32
  }
  func.func @transform_2(%arg0: i32) -> (i32, i32) {
    %c0_i32 = arith.constant 0 : i32
    %c0_i32_0 = arith.constant 0 : i32
    return %arg0, %c0_i32 : i32, i32
  }
}

</mosaic_0001>

<bundles_post_ra>
// kernel: tpu_custom_call.1
= control target key start
LH: loop header
LB: loop body
LE: loop exit
PB: predicated region body
PF: predicated region fallthrough
CT: control target
= control target key end

     0   :  { %7 = vsyncpa [#allocation3], 0  ;;  %s155_s0 = inlined_call_operand.hbm [shape: f32[8,256], index: 0, kind: input, shape index: {}]   ;;  %s156_s1 = inlined_call_operand.hbm [shape: f32[8,128], index: 1, kind: input, shape index: {}]   ;;  %s157_s2 = inlined_call_operand.hbm [shape: f32[8,256], index: 2, kind: output, shape index: {}]  }
   0x1   :  { %8 = vsyncpa [#allocation6], 0 }
   0x2   :  { %9 = vsyncpa [#allocation4], 0  ;;  %s128_s9 = smov [#allocation2]   ;;  %s129_s11 = smov [#allocation5]  }
   0x3   :  { %s16_s10 = sshll.u32 %s128_s9, 4  ;;  %s26_s12 = sshll.u32 %s129_s11, 4  ;;  %s17_s10 = int_to_ptr.vmem [resolvable:$true] %s16_s10  ;;  %s27_s12 = int_to_ptr.vmem [resolvable:$true] %s26_s12 }
   0x4   :  { %s70_s13 = scalar_lea.vmem %s17_s10, 256  ;;  %p75_p1 = scmp.lt.s32.totalorder %s17_s10, %s17_s10 }
   0x5   :  { %p71_p0 = scmp.ne.s32.totalorder %s17_s10, %s70_s13  ;;  %p76_p2 = scmp.lt.s32.totalorder %s70_s13, %s70_s13 }
   0x7   :  { %p77_p3 = por %p76_p2, %p75_p1 }
   0x9   :  { %p78_p4 = pnand %p77_p3, %p71_p0 }
   0xb   :  { %81 = shalt.err (!%p78_p4)
}
   0xc   :  { %19 = dma.hbm_to_vmem [thread:$0]  %s155_s0, 256, %s17_s10, [#allocation3]  }
   0xd   :  { %s90_s16 = scalar_lea.vmem %s27_s12, 128  ;;  %p95_p6 = scmp.lt.s32.totalorder %s27_s12, %s27_s12 }
   0xe   :  { %p91_p5 = scmp.ne.s32.totalorder %s27_s12, %s90_s16  ;;  %p96_p7 = scmp.lt.s32.totalorder %s90_s16, %s90_s16 }
  0x10   :  { %p97_p8 = por %p96_p7, %p95_p6 }
  0x12   :  { %p98_p9 = pnand %p97_p8, %p91_p5 }
  0x14   :  { %101 = shalt.err (!%p98_p9)
}
  0x15   :  { %29 = dma.hbm_to_vmem [thread:$0]  %s156_s1, 128, %s27_s12, [#allocation6]  }
  0x16   :  { %122 = dma.done.wait [#allocation3], 256  }
  0x17   :  { %123 = vsyncadd [#allocation3], 4294967040 }
  0x18   :  { %124 = dma.done.wait [#allocation6], 128  }
  0x19   :  { %125 = vsyncadd [#allocation6], 4294967168  ;;  %s130_s19 = smov [#allocation7]   ;;  %v36_v0 = vld [vmem:[#allocation5] sm:$0xff]  ;;  %v37_v1 = vld [vmem:[#allocation2] sm:$0xff] }
  0x1a   :  { %s49_s20 = sshll.u32 %s130_s19, 4  ;;  %v38_v2 = vld [vmem:[#allocation2 + $0x8] sm:$0xff]  ;;  %v39_v3 = vadd.f32 %v37_v1, %v36_v0  ;;  %s50_s20 = int_to_ptr.vmem [resolvable:$true] %s49_s20 }
  0x1b   :  { %v40_v4 = vadd.f32 %v38_v2, %v36_v0  ;;  %s102_s0 = scalar_lea.vmem %s50_s20, 256  ;;  %p107_p11 = scmp.lt.s32.totalorder %s50_s20, %s50_s20 }
  0x1c   :  { %41 = vst [vmem:[#allocation7] sm:$0xff] %v39_v3  ;;  %p103_p10 = scmp.ne.s32.totalorder %s50_s20, %s102_s0  ;;  %p108_p12 = scmp.lt.s32.totalorder %s102_s0, %s102_s0 }
  0x1d   :  { %42 = vst [vmem:[#allocation7 + $0x8] sm:$0xff] %v40_v4 }
  0x1e   :  { %p109_p13 = por %p108_p12, %p107_p11 }
  0x20   :  { %p110_p0 = pnand %p109_p13, %p103_p10 }
  0x22   :  { %113 = shalt.err (!%p110_p0)
}
  0x23   :  { %52 = dma.vmem_to_hbm [thread:$0]  %s50_s20, 256, %s157_s2, [#allocation4]  }
  0x24   :  { %126 = dma.done.wait [#allocation4], 256  }
  0x25   :  { %127 = vsyncadd [#allocation4], 4294967040 }
  0x26   :  { %56 = vsyncpa [#allocation3], 1 }
  0x27   :  { %57 = vsyncpa [#allocation6], 1 }
  0x28   :  { %58 = vsyncpa [#allocation4], 1 }

</bundles_post_ra>
